<compile_context>
chip_gen: v6e
topology: v6e:2x2x1
jax: 0.10.0
libtpu: 0.0.40
codegen_flags: <defaults>
</compile_context>

<pallas_src>
import jax
import jax.numpy as jnp
from jax.experimental import pallas as pl
from jax.experimental.pallas import tpu as pltpu

LANE = 128
SUBLANE = 8


# ----------------------------------------------------------------------------- helpers
def _round_up(n, m):
    return ((n + m - 1) // m) * m


def _pad_axis(a, axis, target):
    pad = target - a.shape[axis]
    if pad == 0:
        return a
    widths = [(0, 0)] * a.ndim
    widths[axis] = (0, pad)
    return jnp.pad(a, widths)


def _batch_tiling(batch, block_b, compute_dtype):
    itemsize = jnp.dtype(compute_dtype).itemsize
    row_align = SUBLANE * max(1, 4 // itemsize)  # 8 rows for f32, 16 for bf16 (sublane packing)
    if block_b is None:
        # Large tiles amortize the ~0.35 us per-grid-step overhead; the 1024-row cap keeps the
        # double-buffered x/out tiles to a few MiB so we fit v7x's smaller VMEM without raising
        # vmem_limit_bytes (v5e/v6e have 2x the VMEM and are also fine).
        block_b = min(_round_up(batch, row_align), 1024)
    block_b = _round_up(block_b, row_align)
    b_pad = _round_up(batch, block_b)
    return block_b, b_pad


# ----------------------------------------------------------------------------- ConfigEmbedding
def _config_embedding_kernel(x_ref, w1_ref, b1_ref, w2_ref, b2_ref, o_ref):
    # x:[TB,in]  w1:[in,Hp]  b1:[1,Hp]  w2:[Hp,Op]  b2:[1,Op]  o:[TB,Op]   (Hp, Op lane-dense)
    x = x_ref[...]
    h = jnp.dot(x, w1_ref[...], preferred_element_type=jnp.float32)   # MXU, f32 accumulate
    h = jnp.maximum(h + b1_ref[...], 0.0)                             # bias + relu in f32
    h = h.astype(w2_ref.dtype)                                        # back to MXU-native dtype
    o = jnp.dot(h, w2_ref[...], preferred_element_type=jnp.float32)
    o = jnp.maximum(o + b2_ref[...], 0.0)
    o_ref[...] = o.astype(o_ref.dtype)                                # full-width (lane-dense) store


def config_embedding_forward(x, w1, b1, w2, b2, *, block_b=None, compute_dtype=jnp.bfloat16):
    """ConfigEmbedding.forward: relu(relu(x @ w1 + b1) @ w2 + b2).

    x: [B, in_dim] f32.  Weights stored pre-transposed: w1 [in_dim, hidden], w2 [hidden, out_dim].
    Returns [B, out_dim] f32.
    """
    B, in_dim = x.shape
    hidden = w1.shape[1]
    out_dim = w2.shape[1]

    # Lane-dense padding of hidden / output feature axes (kills masked stores).
    hidden_p = _round_up(hidden, LANE)
    out_p = _round_up(out_dim, LANE)
    w1p = _pad_axis(w1, 1, hidden_p).astype(compute_dtype)
    b1p = _pad_axis(b1.reshape(1, hidden), 1, hidden_p).astype(jnp.float32)
    w2p = _pad_axis(_pad_axis(w2, 0, hidden_p), 1, out_p).astype(compute_dtype)
    b2p = _pad_axis(b2.reshape(1, out_dim), 1, out_p).astype(jnp.float32)

    block_b, b_pad = _batch_tiling(B, block_b, compute_dtype)
    xp = _pad_axis(x, 0, b_pad).astype(compute_dtype)

    out = pl.pallas_call(
        _config_embedding_kernel,
        out_shape=jax.ShapeDtypeStruct((b_pad, out_p), jnp.float32),
        grid=(b_pad // block_b,),
        in_specs=[
            pl.BlockSpec((block_b, in_dim), lambda i: (i, 0)),    # x tile (streamed over batch)
            pl.BlockSpec((in_dim, hidden_p), lambda i: (0, 0)),   # w1 (VMEM-resident)
            pl.BlockSpec((1, hidden_p), lambda i: (0, 0)),        # b1 (f32)
            pl.BlockSpec((hidden_p, out_p), lambda i: (0, 0)),    # w2
            pl.BlockSpec((1, out_p), lambda i: (0, 0)),           # b2 (f32)
        ],
        out_specs=pl.BlockSpec((block_b, out_p), lambda i: (i, 0)),
        compiler_params=pltpu.CompilerParams(dimension_semantics=("parallel",)),
    )(xp, w1p, b1p, w2p, b2p)
    return out[:B, :out_dim]


def config_embedding_reference(x, w1, b1, w2, b2, *, compute_dtype=jnp.float32):
    cd = compute_dtype
    h = jnp.dot(x.astype(cd), w1.astype(cd), preferred_element_type=jnp.float32) + b1
    h = jnp.maximum(h, 0.0)
    o = jnp.dot(h.astype(cd), w2.astype(cd), preferred_element_type=jnp.float32) + b2
    return jnp.maximum(o, 0.0)


# ----------------------------------------------------------------------------- RegressionHead
def _regression_head_kernel(x_ref, w1_ref, b1_ref, w2_ref, b2_ref,
                            wmu_ref, bmu_ref, wsig_ref, bsig_ref,
                            mu_ref, sig_ref):
    cd = w1_ref.dtype
    x = x_ref[...]
    h = jnp.dot(x, w1_ref[...], preferred_element_type=jnp.float32)
    h = jnp.maximum(h + b1_ref[...], 0.0).astype(cd)
    h = jnp.dot(h, w2_ref[...], preferred_element_type=jnp.float32)
    h = jnp.maximum(h + b2_ref[...], 0.0).astype(cd)
    mu = jnp.dot(h, wmu_ref[...], preferred_element_type=jnp.float32) + bmu_ref[...]
    sg = jnp.dot(h, wsig_ref[...], preferred_element_type=jnp.float32) + bsig_ref[...]
    mu_ref[...] = mu.astype(mu_ref.dtype)
    sig_ref[...] = jnp.exp(sg).astype(sig_ref.dtype)   # exp on the EUP, f32


def regression_head_forward(x, w1, b1, w2, b2, wmu, bmu, wsig, bsig,
                            *, block_b=None, compute_dtype=jnp.bfloat16):
    """RegressionHead.forward: h = relu(lin1(x)); h = relu(lin2(h)); mu = lin3_mu(h);
    sig = exp(lin3_sig(h)).  Returns (mu, sig), each [B, out_dim] f32."""
    B, in_dim = x.shape
    h1, h2 = w1.shape[1], w2.shape[1]
    out_dim = wmu.shape[1]

    h1_p, h2_p, out_p = _round_up(h1, LANE), _round_up(h2, LANE), _round_up(out_dim, LANE)
    w1p = _pad_axis(w1, 1, h1_p).astype(compute_dtype)
    b1p = _pad_axis(b1.reshape(1, h1), 1, h1_p).astype(jnp.float32)
    w2p = _pad_axis(_pad_axis(w2, 0, h1_p), 1, h2_p).astype(compute_dtype)
    b2p = _pad_axis(b2.reshape(1, h2), 1, h2_p).astype(jnp.float32)
    wmup = _pad_axis(_pad_axis(wmu, 0, h2_p), 1, out_p).astype(compute_dtype)
    bmup = _pad_axis(bmu.reshape(1, out_dim), 1, out_p).astype(jnp.float32)
    wsigp = _pad_axis(_pad_axis(wsig, 0, h2_p), 1, out_p).astype(compute_dtype)
    bsigp = _pad_axis(bsig.reshape(1, out_dim), 1, out_p).astype(jnp.float32)

    block_b, b_pad = _batch_tiling(B, block_b, compute_dtype)
    xp = _pad_axis(x, 0, b_pad).astype(compute_dtype)

    mu, sig = pl.pallas_call(
        _regression_head_kernel,
        out_shape=(jax.ShapeDtypeStruct((b_pad, out_p), jnp.float32),
                   jax.ShapeDtypeStruct((b_pad, out_p), jnp.float32)),
        grid=(b_pad // block_b,),
        in_specs=[
            pl.BlockSpec((block_b, in_dim), lambda i: (i, 0)),   # x tile (streamed)
            pl.BlockSpec((in_dim, h1_p), lambda i: (0, 0)),      # lin1 weight (resident)
            pl.BlockSpec((1, h1_p), lambda i: (0, 0)),
            pl.BlockSpec((h1_p, h2_p), lambda i: (0, 0)),        # lin2 weight
            pl.BlockSpec((1, h2_p), lambda i: (0, 0)),
            pl.BlockSpec((h2_p, out_p), lambda i: (0, 0)),       # lin3_mu weight
            pl.BlockSpec((1, out_p), lambda i: (0, 0)),
            pl.BlockSpec((h2_p, out_p), lambda i: (0, 0)),       # lin3_sig weight
            pl.BlockSpec((1, out_p), lambda i: (0, 0)),
        ],
        out_specs=(pl.BlockSpec((block_b, out_p), lambda i: (i, 0)),
                   pl.BlockSpec((block_b, out_p), lambda i: (i, 0))),
        compiler_params=pltpu.CompilerParams(dimension_semantics=("parallel",)),
    )(xp, w1p, b1p, w2p, b2p, wmup, bmup, wsigp, bsigp)
    return mu[:B, :out_dim], sig[:B, :out_dim]


def regression_head_reference(x, w1, b1, w2, b2, wmu, bmu, wsig, bsig, *, compute_dtype=jnp.float32):
    cd = compute_dtype
    h = jnp.maximum(jnp.dot(x.astype(cd), w1.astype(cd), preferred_element_type=jnp.float32) + b1, 0.0)
    h = jnp.maximum(jnp.dot(h.astype(cd), w2.astype(cd), preferred_element_type=jnp.float32) + b2, 0.0)
    mu = jnp.dot(h.astype(cd), wmu.astype(cd), preferred_element_type=jnp.float32) + bmu
    sig = jnp.exp(jnp.dot(h.astype(cd), wsig.astype(cd), preferred_element_type=jnp.float32) + bsig)
    return mu, sig


# --------------------------------------------------------- ConfigPerformanceRegressor tail
def config_performance_regressor_head(graph_embedding, w1, b1, w2, b2, wmu, bmu, wsig, bsig,
                                      *, block_b=None, compute_dtype=jnp.bfloat16):
    """ConfigPerformanceRegressor.forward minus the GNN: regression head on the graph embedding,
    then torch.stack((mu, sig), axis=-1).
    # TODO(synk): MilpGNN (GraphConv message passing + global max / attention pooling) is not
    # implemented as a Pallas kernel; `graph_embedding` is taken as an input here."""
    mu, sig = regression_head_forward(graph_embedding, w1, b1, w2, b2, wmu, bmu, wsig, bsig,
                                      block_b=block_b, compute_dtype=compute_dtype)
    return jnp.stack([mu, sig], axis=-1)


# ----------------------------------------------------------------------------- demo / check
if __name__ == "__main__":
    key = jax.random.PRNGKey(0)
    keys = jax.random.split(key, 16)

    # Small shapes consistent with ConfigPerformanceRegressor(config_dim=16, gnn_hidden_dim=64):
    B = 8
    config_dim = 16
    gnn_hidden = 64
    emb_hidden, emb_out = 64, 8                      # ConfigEmbedding
    head_in, head_hidden = 4 * gnn_hidden, 8 * gnn_hidden  # RegressionHead: 256 -> 512

    def linear_params(kw, kb, fan_in, fan_out):
        bound = 1.0 / jnp.sqrt(fan_in)
        w = jax.random.uniform(kw, (fan_in, fan_out), jnp.float32, -bound, bound)
        b = jax.random.uniform(kb, (fan_out,), jnp.float32, -bound, bound)
        return w, b

    # ConfigEmbedding params (stored [in, out]).
    ce_w1, ce_b1 = linear_params(keys[0], keys[1], config_dim, emb_hidden)
    ce_w2, ce_b2 = linear_params(keys[2], keys[3], emb_hidden, emb_out)
    # RegressionHead params.
    rh_w1, rh_b1 = linear_params(keys[4], keys[5], head_in, head_hidden)
    rh_w2, rh_b2 = linear_params(keys[6], keys[7], head_hidden, head_hidden)
    rh_wmu, rh_bmu = linear_params(keys[8], keys[9], head_hidden, config_dim)
    rh_wsig, rh_bsig = linear_params(keys[10], keys[11], head_hidden, config_dim)

    config_x = jax.random.normal(keys[12], (B, config_dim), jnp.float32)
    # Stand-in for the MilpGNN output (graph embedding of width 4*gnn_hidden).
    graph_embedding = jax.random.normal(keys[13], (B, head_in), jnp.float32)

    # --- ConfigEmbedding kernel ---
    emb = config_embedding_forward(config_x, ce_w1, ce_b1, ce_w2, ce_b2)
    emb = jax.block_until_ready(emb)
    emb_ref = config_embedding_reference(config_x, ce_w1, ce_b1, ce_w2, ce_b2,
                                         compute_dtype=jnp.bfloat16)
    assert emb.shape == (B, emb_out)
    assert jnp.allclose(emb, emb_ref, atol=2e-3, rtol=2e-3), "ConfigEmbedding mismatch"

    # --- RegressionHead kernel + stacked (mu, sig) output ---
    pred = config_performance_regressor_head(
        graph_embedding, rh_w1, rh_b1, rh_w2, rh_b2, rh_wmu, rh_bmu, rh_wsig, rh_bsig)
    pred = jax.block_until_ready(pred)
    mu_ref, sig_ref = regression_head_reference(
        graph_embedding, rh_w1, rh_b1, rh_w2, rh_b2, rh_wmu, rh_bmu, rh_wsig, rh_bsig,
        compute_dtype=jnp.bfloat16)
    pred_ref = jnp.stack([mu_ref, sig_ref], axis=-1)
    assert pred.shape == (B, config_dim, 2)
    assert jnp.allclose(pred, pred_ref, atol=2e-3, rtol=2e-3), "RegressionHead mismatch"

    print("KERNEL_OK")
</pallas_src>

<mosaic_0001>
module attributes {stable_mosaic.version = 11 : i64} {
  func.func @_config_embedding_kernel(%arg0: i32, %arg1: memref<16x16xbf16, #tpu.memory_space<vmem>>, %arg2: memref<16x128xbf16, #tpu.memory_space<vmem>>, %arg3: memref<1x128xf32, #tpu.memory_space<vmem>>, %arg4: memref<128x128xbf16, #tpu.memory_space<vmem>>, %arg5: memref<1x128xf32, #tpu.memory_space<vmem>>, %arg6: memref<16x128xf32, #tpu.memory_space<vmem>>) attributes {dimension_semantics = [#tpu.dimension_semantics<parallel>], iteration_bounds = array<i64: 1>, scalar_prefetch = 0 : i64, scratch_operands = 0 : i64, tpu.core_type = #tpu.core_type<tc>, window_params = [{transform_indices = @transform_0, window_bounds = array<i64: 16, 16>}, {pipeline_mode = #tpu.pipeline_mode<synchronous>, transform_indices = @transform_1, window_bounds = array<i64: 16, 128>}, {pipeline_mode = #tpu.pipeline_mode<synchronous>, transform_indices = @transform_2, window_bounds = array<i64: 1, 128>}, {pipeline_mode = #tpu.pipeline_mode<synchronous>, transform_indices = @transform_3, window_bounds = array<i64: 128, 128>}, {pipeline_mode = #tpu.pipeline_mode<synchronous>, transform_indices = @transform_4, window_bounds = array<i64: 1, 128>}, {transform_indices = @transform_5, window_bounds = array<i64: 16, 128>}]} {
    %c0 = arith.constant 0 : index
    %c0_0 = arith.constant 0 : index
    %0 = vector.load %arg1[%c0, %c0_0] : memref<16x16xbf16, #tpu.memory_space<vmem>>, vector<16x16xbf16>
    %c0_1 = arith.constant 0 : index
    %c0_2 = arith.constant 0 : index
    %1 = vector.load %arg2[%c0_1, %c0_2] : memref<16x128xbf16, #tpu.memory_space<vmem>>, vector<16x128xbf16>
    %cst = arith.constant dense<0.000000e+00> : vector<16x128xf32>
    %2 = tpu.matmul %0, %1, %cst {dimension_numbers = #tpu.dot_dimension_numbers<[1], [0], [0], [1], [0, 0, 1, 1], [], []>} : vector<16x16xbf16>, vector<16x128xbf16>, vector<16x128xf32> -> vector<16x128xf32>
    %c0_3 = arith.constant 0 : index
    %c0_4 = arith.constant 0 : index
    %3 = vector.load %arg3[%c0_3, %c0_4] : memref<1x128xf32, #tpu.memory_space<vmem>>, vector<1x128xf32>
    %4 = vector.broadcast %3 : vector<1x128xf32> to vector<16x128xf32>
    %5 = arith.addf %2, %4 : vector<16x128xf32>
    %cst_5 = arith.constant 0.000000e+00 : f32
    %6 = vector.broadcast %cst_5 : f32 to vector<16x128xf32>
    %7 = arith.maximumf %5, %6 : vector<16x128xf32>
    %8 = arith.truncf %7 : vector<16x128xf32> to vector<16x128xbf16>
    %c0_6 = arith.constant 0 : index
    %c0_7 = arith.constant 0 : index
    %9 = vector.load %arg4[%c0_6, %c0_7] : memref<128x128xbf16, #tpu.memory_space<vmem>>, vector<128x128xbf16>
    %cst_8 = arith.constant dense<0.000000e+00> : vector<16x128xf32>
    %10 = tpu.matmul %8, %9, %cst_8 {dimension_numbers = #tpu.dot_dimension_numbers<[1], [0], [0], [1], [0, 0, 1, 1], [], []>} : vector<16x128xbf16>, vector<128x128xbf16>, vector<16x128xf32> -> vector<16x128xf32>
    %c0_9 = arith.constant 0 : index
    %c0_10 = arith.constant 0 : index
    %11 = vector.load %arg5[%c0_9, %c0_10] : memref<1x128xf32, #tpu.memory_space<vmem>>, vector<1x128xf32>
    %12 = vector.broadcast %11 : vector<1x128xf32> to vector<16x128xf32>
    %13 = arith.addf %10, %12 : vector<16x128xf32>
    %cst_11 = arith.constant 0.000000e+00 : f32
    %14 = vector.broadcast %cst_11 : f32 to vector<16x128xf32>
    %15 = arith.maximumf %13, %14 : vector<16x128xf32>
    %c0_12 = arith.constant 0 : index
    %c0_13 = arith.constant 0 : index
    %16 = vector.load %arg6[%c0_12, %c0_13] : memref<16x128xf32, #tpu.memory_space<vmem>>, vector<16x128xf32>
    tpu.vector_store %arg6[%c0_12, %c0_13], %15 {strides = array<i32>} : memref<16x128xf32, #tpu.memory_space<vmem>>, vector<16x128xf32>,
    return
  }
  func.func @transform_0(%arg0: i32) -> (i32, i32) {
    %c0_i32 = arith.constant 0 : i32
    %c0_i32_0 = arith.constant 0 : i32
    return %arg0, %c0_i32 : i32, i32
  }
  func.func @transform_1(%arg0: i32) -> (i32, i32) {
    %c0_i32 = arith.constant 0 : i32
    %c0_i32_0 = arith.constant 0 : i32
    %c0_i32_1 = arith.constant 0 : i32
    return %c0_i32, %c0_i32_0 : i32, i32
  }
  func.func @transform_2(%arg0: i32) -> (i32, i32) {
    %c0_i32 = arith.constant 0 : i32
    %c0_i32_0 = arith.constant 0 : i32
    %c0_i32_1 = arith.constant 0 : i32
    return %c0_i32, %c0_i32_0 : i32, i32
  }
  func.func @transform_3(%arg0: i32) -> (i32, i32) {
    %c0_i32 = arith.constant 0 : i32
    %c0_i32_0 = arith.constant 0 : i32
    %c0_i32_1 = arith.constant 0 : i32
    return %c0_i32, %c0_i32_0 : i32, i32
  }
  func.func @transform_4(%arg0: i32) -> (i32, i32) {
    %c0_i32 = arith.constant 0 : i32
    %c0_i32_0 = arith.constant 0 : i32
    %c0_i32_1 = arith.constant 0 : i32
    return %c0_i32, %c0_i32_0 : i32, i32
  }
  func.func @transform_5(%arg0: i32) -> (i32, i32) {
    %c0_i32 = arith.constant 0 : i32
    %c0_i32_0 = arith.constant 0 : i32
    return %arg0, %c0_i32 : i32, i32
  }
}

</mosaic_0001>

<bundles_post_ra>
// kernel: tpu_custom_call.1
= control target key start
LH: loop header
LB: loop body
LE: loop exit
PB: predicated region body
PF: predicated region fallthrough
CT: control target
= control target key end

     0   :  { %10 = vsyncpa [#allocation3], 0  ;;  %s481_s0 = inlined_call_operand.hbm [shape: bf16[16,16], index: 0, kind: input, shape index: {}]   ;;  %s482_s1 = inlined_call_operand.hbm [shape: bf16[16,128], index: 1, kind: input, shape index: {}]   ;;  %s483_s2 = inlined_call_operand.vmem [shape: f32[1,128], index: 2, kind: input, shape index: {}]   ;;  %s484_s3 = inlined_call_operand.hbm [shape: bf16[128,128], index: 3, kind: input, shape index: {}]   ;;  %s485_s4 = inlined_call_operand.vmem [shape: f32[1,128], index: 4, kind: input, shape index: {}]   ;;  %s486_s5 = inlined_call_operand.hbm [shape: f32[16,128], index: 5, kind: output, shape index: {}]  }
   0x1   :  { %11 = vsyncpa [#allocation6], 0 }
   0x2   :  { %12 = vsyncpa [#allocation4], 0  ;;  %s423_s18 = smov [#allocation5]   ;;  %s424_s20 = smov [#allocation2]  }
   0x3   :  { %s30_s19 = sshll.u32 %s423_s18, 4  ;;  %s18_s21 = sshll.u32 %s424_s20, 4  ;;  %s31_s19 = int_to_ptr.vmem [resolvable:$true] %s30_s19  ;;  %s19_s21 = int_to_ptr.vmem [resolvable:$true] %s18_s21 }
   0x4   :  { %s345_s22 = scalar_lea.vmem %s31_s19, 128  ;;  %p350_p1 = scmp.lt.s32.totalorder %s31_s19, %s31_s19 }
   0x5   :  { %p346_p0 = scmp.ne.s32.totalorder %s31_s19, %s345_s22  ;;  %p351_p2 = scmp.lt.s32.totalorder %s345_s22, %s345_s22 }
   0x7   :  { %p352_p3 = por %p351_p2, %p350_p1 }
   0x9   :  { %p353_p4 = pnand %p352_p3, %p346_p0 }
   0xb   :  { %356 = shalt.err (!%p353_p4)
}
   0xc   :  { %s425_s23 = smov 64   ;;  %s426_s24 = smov 4  }
   0xd   :  { %36 = dma.hbm_to_vmem [thread:$0]  %s482_s1, 128, %s31_s19, [#allocation6], %s425_s23, %s425_s23, %s426_s24  }
   0xe   :  { %s365_s27 = scalar_lea.vmem %s19_s21, 128  ;;  %p370_p6 = scmp.lt.s32.totalorder %s19_s21, %s19_s21 }
   0xf   :  { %p366_p5 = scmp.ne.s32.totalorder %s19_s21, %s365_s27  ;;  %p371_p7 = scmp.lt.s32.totalorder %s365_s27, %s365_s27 }
  0x11   :  { %p372_p8 = por %p371_p7, %p370_p6 }
  0x13   :  { %p373_p9 = pnand %p372_p8, %p366_p5 }
  0x15   :  { %376 = shalt.err (!%p373_p9)
}
  0x16   :  { %24 = dma.hbm_to_vmem [thread:$0]  %s481_s0, 128, %s19_s21, [#allocation3], %s425_s23, %s425_s23, %s426_s24  }
  0x17   :  { %s427_s30 = smov [#allocation7]  }
  0x18   :  { %s44_s6 = sshll.u32 %s427_s30, 4  ;;  %s45_s6 = int_to_ptr.vmem [resolvable:$true] %s44_s6 }
  0x19   :  { %s385_s7 = scalar_lea.vmem %s45_s6, 1024  ;;  %p390_p11 = scmp.lt.s32.totalorder %s45_s6, %s45_s6 }
  0x1a   :  { %p386_p10 = scmp.ne.s32.totalorder %s45_s6, %s385_s7  ;;  %p391_p12 = scmp.lt.s32.totalorder %s385_s7, %s385_s7 }
  0x1c   :  { %p392_p13 = por %p391_p12, %p390_p11 }
  0x1e   :  { %p393_p0 = pnand %p392_p13, %p386_p10 }
  0x20   :  { %396 = shalt.err (!%p393_p0)
}
  0x21   :  { %50 = dma.hbm_to_vmem [thread:$0]  %s484_s3, 1024, %s45_s6, [#allocation6], %s425_s23, %s425_s23, %s426_s24  }
  0x22   :  { %417 = dma.done.wait [#allocation3], 128  }
  0x23   :  { %418 = vsyncadd [#allocation3], 4294967168 }
  0x24   :  { %419 = dma.done.wait [#allocation6], 1152  }
  0x25   :  { %420 = vsyncadd [#allocation6], 4294966144  ;;  %v428_v0 = vmov 0.0   ;;  %vm429_vm0 = vmmov 0   ;;  %v327_v1 = vld [vmem:[#allocation5] sm:$0xff]   ;;  %v328_v2 = vld [vmem:[#allocation2] sm:$0xff]  }
  0x26   :  { %291 = vmatprep.subr.bf16.mxu0 %v428_v0  ;;  %293 = vmatprep.mubr.msk.bf16.mxu0 %vm429_vm0, %v428_v0  ;;  %vm85_vm1 = vcmask 130048   ;;  %v329_v3 = vld [vmem:[#allocation7 + $0x38] sm:$0xff]   ;;  %v330_v4 = vld [vmem:[#allocation7 + $0x30] sm:$0xff]   ;;  %v331_v5 = vld [vmem:[#allocation7 + $0x28] sm:$0xff]   ;;  %s430_s11 = smov [#allocation8]  }
  0x27   :  { %297 = vmatprep.subr.bf16.mxu1 %v428_v0  ;;  %313 = vmatprep.mubr.msk.bf16.mxu1 %vm429_vm0, %v428_v0  ;;  %v332_v6 = vld [vmem:[#allocation7 + $0x20] sm:$0xff]   ;;  %v333_v7 = vld [vmem:[#allocation7 + $0x18] sm:$0xff]   ;;  %v334_v8 = vld [vmem:[#allocation7 + $0x10] sm:$0xff]  }
  0x28   :  { %292 = vmatpush3.bf16.msra.mxu0 %v327_v1  ;;  %298 = vmatpush3.bf16.msra.mxu1 %v329_v3  ;;  %v335_v9 = vld [vmem:[#allocation7 + $0x8] sm:$0xff]   ;;  %v336_v10 = vld [vmem:[#allocation7] sm:$0xff]   ;;  %v267_v11 = vld [vmem:[%s483_s2] ss:$0 sm:$0xff]  ;;  %s254_s2 = sshll.u32 %s430_s11, 4  ;;  %s255_s2 = int_to_ptr.vmem [resolvable:$true] %s254_s2 }
  0x29   :  { %299 = vmatprep.subr.bf16.mxu1 %v428_v0  ;;  %v271_v21 = vld [vmem:[%s485_s4] ss:$0 sm:$0xff]  ;;  %s397_s12 = scalar_lea.vmem %s255_s2, 256  ;;  %p402_p2 = scmp.lt.s32.totalorder %s255_s2, %s255_s2 }
  0x2a   :  { %p398_p1 = scmp.ne.s32.totalorder %s255_s2, %s397_s12  ;;  %p403_p3 = scmp.lt.s32.totalorder %s397_s12, %s397_s12 }
  0x2b   :  { %294 = vmatmul.mubr.msk.bf16.vlgmr.msra.gmra.mxu0 %vm85_vm1, %v328_v2 }
  0x2c   :  { %300 = vmatpush3.bf16.msra.mxu1 %v330_v4  ;;  %p404_p4 = por %p403_p3, %p402_p2 }
  0x2d   :  { %301 = vmatprep.subr.bf16.mxu1 %v428_v0 }
  0x2e   :  { %p405_p5 = pnand %p404_p4, %p398_p1 }
  0x30   :  { %302 = vmatpush3.bf16.msra.mxu1 %v331_v5 }
  0x31   :  { %303 = vmatprep.subr.bf16.mxu1 %v428_v0 }
  0x34   :  { %304 = vmatpush3.bf16.msra.mxu1 %v332_v6 }
  0x35   :  { %305 = vmatprep.subr.bf16.mxu1 %v428_v0 }
  0x38   :  { %306 = vmatpush3.bf16.msra.mxu1 %v333_v7 }
  0x39   :  { %307 = vmatprep.subr.bf16.mxu1 %v428_v0 }
  0x3c   :  { %308 = vmatpush3.bf16.msra.mxu1 %v334_v8 }
  0x3d   :  { %309 = vmatprep.subr.bf16.mxu1 %v428_v0 }
  0x40   :  { %310 = vmatpush3.bf16.msra.mxu1 %v335_v9 }
  0x41   :  { %311 = vmatprep.subr.bf16.mxu1 %v428_v0 }
  0x44   :  { %312 = vmatpush3.bf16.msra.mxu1 %v336_v10 }
  0xeb   :  { %v123_v12 = vpop.f32.mrf.mxu0 }
  0xec   :  { %v124_v14 = vadd.f32 %v267_v11, %v123_v12 }
  0xed   :  { %v295_v13 = vpop.f32.mrf.mxu0 }
  0xee   :  { %v130_v18 = vmax.f32 %v124_v14, 0.0 }
  0xef   :  { %v126_v15 = vpop.f32.mrf.mxu0 }
  0xf0   :  { %v127_v16 = vadd.f32 %v267_v11, %v126_v15 }
  0xf1   :  { %v296_v17 = vpop.f32.mrf.mxu0 }
  0xf2   :  { %v131_v19 = vmax.f32 %v127_v16, 0.0 }
  0xf4   :  { %v132_v20 = vpack.c.bf16 %v131_v19, %v130_v18 }
  0xf6   :  { %314 = vmatmul.mubr.bf16.vlgmr.msra.gmra.mxu1 %v132_v20 }
 0x1b6   :  { %v238_v22 = vpop.f32.mrf.mxu1 }
 0x1b7   :  { %v239_v23 = vadd.f32 %v271_v21, %v238_v22 }
 0x1b8   :  { %v315_v24 = vpop.f32.mrf.mxu1 }
 0x1b9   :  { %v245_v25 = vmax.f32 %v239_v23, 0.0 }
 0x1ba   :  { %v241_v26 = vpop.f32.mrf.mxu1 }
 0x1bb   :  { %247 = vst [vmem:[#allocation8] sm:$0xff] %v245_v25  ;;  %v242_v27 = vadd.f32 %v271_v21, %v241_v26 }
 0x1bc   :  { %v316_v28 = vpop.f32.mrf.mxu1 }
 0x1bd   :  { %v246_v29 = vmax.f32 %v242_v27, 0.0 }
 0x1bf   :  { %248 = vst [vmem:[#allocation8 + $0x8] sm:$0xff] %v246_v29 }
 0x1c0   :  { %408 = shalt.err (!%p405_p5)
}
 0x1c1   :  { %s431_s4 = smov 128   ;;  %s432_s13 = smov 8  }
 0x1c2   :  { %260 = dma.vmem_to_hbm [thread:$0]  %s255_s2, 256, %s486_s5, [#allocation4], %s431_s4, %s431_s4, %s432_s13  }
 0x1c3   :  { %421 = dma.done.wait [#allocation4], 256  }
 0x1c4   :  { %422 = vsyncadd [#allocation4], 4294967040 }
 0x1c5   :  { %264 = vsyncpa [#allocation3], 1 }
 0x1c6   :  { %265 = vsyncpa [#allocation6], 1 }
 0x1c7   :  { %266 = vsyncpa [#allocation4], 1 }

</bundles_post_ra>
